<compile_context>
chip_gen: v7x
topology: tpu7x:2x2x1
jax: 0.10.0
libtpu: 0.0.40
codegen_flags: <defaults>
</compile_context>

<pallas_src>
from math import sqrt

import jax
import jax.numpy as jnp
import numpy as np
from jax import lax
from jax.experimental import pallas as pl
from jax.experimental.pallas import tpu as pltpu


def _round_up(x, m):
    return ((x + m - 1) // m) * m


def _tpu_generation_config():
    """Return (per_block_vmem_budget, vmem_limit_cap, multi_tensorcore)."""
    vmem = None
    try:
        vmem = int(pltpu.get_tpu_info().vmem_capacity_bytes)
    except Exception:
        vmem = None
    if vmem is None:
        try:
            kind = jax.devices()[0].device_kind.lower()
        except Exception:
            kind = ""
        if "7" in kind:                       # v7x class
            vmem = 64 << 20
        elif any(t in kind for t in ("v4", "v5", "v6")):
            vmem = 128 << 20
        else:
            vmem = 64 << 20                   # conservative default
    if vmem <= (96 << 20):
        # v7x class: 64 MiB VMEM, 2 TensorCores -> modest blocks, feed both TCs.
        return 24 << 20, 48 << 20, True
    # v5e / v6e class: 128 MiB VMEM, 1 TensorCore -> big blocks, no 2-block rule.
    return 88 << 20, 100 << 20, False


# ------------------------------ Pallas kernels ------------------------------ #

def _pool_gemm_single_k_kernel(x_ref, w_ref, b_ref, o_ref):
    # x: (tm, Kp) bf16   w: (Kp, Np) bf16   b: (1, Np) f32   o: (tm, Np)
    o_ref[...] = (jnp.dot(x_ref[...], w_ref[...],
                          preferred_element_type=jnp.float32)
                  + b_ref[...]).astype(o_ref.dtype)


def _pool_gemm_acc_kernel(x_ref, w_ref, b_ref, o_ref, acc_ref):
    # Fallback tiled-K path: f32 accumulator in VMEM scratch, K innermost.
    @pl.when(pl.program_id(1) == 0)
    def _():
        acc_ref[...] = jnp.zeros_like(acc_ref)

    acc_ref[...] += jnp.dot(x_ref[...], w_ref[...],
                            preferred_element_type=jnp.float32)

    @pl.when(pl.program_id(1) == pl.num_programs(1) - 1)
    def _():
        o_ref[...] = (acc_ref[...] + b_ref[...]).astype(o_ref.dtype)


def _fused_downsample_gemm(taps, w, b, out_dtype):
    """taps: (M, K) bf16, w: (K, Np) bf16, b: (1, Np) f32 -> (M, Np) out_dtype."""
    M, K = taps.shape
    Np = w.shape[1]
    in_bytes = taps.dtype.itemsize
    w_bytes = w.dtype.itemsize
    out_bytes = jnp.dtype(out_dtype).itemsize

    budget, vmem_cap, multi_tc = _tpu_generation_config()

    # Keep K = 9C as one block whenever the (double-buffered) folded weight
    # fits comfortably in the per-block budget.
    Kp_single = _round_up(K, 128)
    single_k = (2 * Kp_single * Np * w_bytes) <= budget // 2

    if single_k:
        Kp = tk = Kp_single
    else:
        tk = 512
        Kp = _round_up(K, tk)

    # Pick the largest M tile that fits the generation-aware VMEM budget.
    tm = 4096
    while tm > 8:
        est = (2 * tm * tk * in_bytes          # double-buffered taps block
               + 2 * tk * Np * w_bytes         # weight block
               + 2 * tm * Np * out_bytes)      # double-buffered output block
        if not single_k:
            est += tm * Np * 4                 # f32 accumulator scratch
        if est <= budget:
            break
        tm //= 2
    tm = min(tm, _round_up(M, 8))
    if multi_tc:
        # v7x: keep >= 2 parallel M blocks (when there is enough work) so both
        # TensorCores stay busy.
        while tm >= 512 and (M + tm - 1) // tm < 2:
            tm = _round_up(tm // 2, 8)
    Mp = _round_up(M, tm)

    # These pads fuse with the upstream im2col / bf16-cast fusion (pallas_call
    # is the only materialization barrier), so no extra full-tensor copy.
    if (Mp, Kp) != (M, K):
        taps = jnp.pad(taps, ((0, Mp - M), (0, Kp - K)))
    if Kp != K:
        w = jnp.pad(w, ((0, Kp - K), (0, 0)))

    vmem_est = (2 * tm * tk * in_bytes + 2 * tk * Np * w_bytes
                + 2 * tm * Np * out_bytes
                + (0 if single_k else tm * Np * 4) + (2 << 20))
    vmem_limit = int(min(max(vmem_est, 16 << 20), vmem_cap))

    if single_k:
        out = pl.pallas_call(
            _pool_gemm_single_k_kernel,
            out_shape=jax.ShapeDtypeStruct((Mp, Np), out_dtype),
            grid=(Mp // tm,),
            in_specs=[pl.BlockSpec((tm, Kp), lambda i: (i, 0)),
                      pl.BlockSpec((Kp, Np), lambda i: (0, 0)),
                      pl.BlockSpec((1, Np), lambda i: (0, 0))],
            out_specs=pl.BlockSpec((tm, Np), lambda i: (i, 0)),
            compiler_params=pltpu.CompilerParams(
                dimension_semantics=("parallel",),
                vmem_limit_bytes=vmem_limit),
        )(taps, w, b)
        return out[:M]

    # TODO(synk): when this path triggers (very large C), keep the folded
    # weight fully VMEM-resident (manual DMA once) instead of re-fetching
    # W tiles for every M block.
    out = pl.pallas_call(
        _pool_gemm_acc_kernel,
        out_shape=jax.ShapeDtypeStruct((Mp, Np), out_dtype),
        grid=(Mp // tm, Kp // tk),
        in_specs=[pl.BlockSpec((tm, tk), lambda i, k: (i, k)),
                  pl.BlockSpec((tk, Np), lambda i, k: (k, 0)),
                  pl.BlockSpec((1, Np), lambda i, k: (0, 0))],
        out_specs=pl.BlockSpec((tm, Np), lambda i, k: (i, 0)),
        scratch_shapes=[pltpu.VMEM((tm, Np), jnp.float32)],
        compiler_params=pltpu.CompilerParams(
            dimension_semantics=("parallel", "arbitrary"),
            vmem_limit_bytes=vmem_limit),
    )(taps, w, b)
    return out[:M]


# --------------------------------- forward --------------------------------- #

def pool_forward(x, params):
    """Pool.forward: x (B, 1 + H*W, C) -> (B, 1 + (H/2)*(W/2), 2C)."""
    B, N1, C = x.shape
    H = W = int(round(sqrt(N1 - 1)))     # PiT uses square, even token grids
    assert H * W == N1 - 1 and H % 2 == 0
    C2 = 2 * C
    Ho, Wo = H // 2, W // 2
    M = B * Ho * Wo

    cls_tok = x[:, 0, :]
    tokens = x[:, 1:, :].reshape(B, H, W, C)          # 'b (h w) c -> b h w c'

    # cls_ff Linear in plain XLA (too small to amortize a separate pallas_call).
    cls_out = cls_tok @ params['cls_w'].T + params['cls_b']

    # im2col of the 3x3 stride-2 window (pad=1): (B, Ho, Wo, 9C) -> (M, 9C).
    xp = jnp.pad(tokens, ((0, 0), (1, 1), (1, 1), (0, 0)))
    taps = jnp.concatenate(
        [xp[:, ki:ki + 2 * Ho:2, kj:kj + 2 * Wo:2, :]
         for ki in range(3) for kj in range(3)], axis=-1)
    taps = taps.reshape(M, 9 * C)

    # Fold depthwise (groups=C, 2 out ch / group) + pointwise 1x1 into one GEMM.
    dw = params['dw_w'].reshape(C2, 9)            # [o, t], t = ki*3 + kj
    pw = params['pw_w'][:, :, 0, 0]               # [j, o]
    dw_tcs = dw.T.reshape(9, C, 2)                # [t, c, s] = dw[2c+s, t]
    pw_csj = pw.T.reshape(C, 2, C2)               # [c, s, j] = pw[j, 2c+s]
    w_fold = jnp.einsum('tcs,csj->tcj', dw_tcs, pw_csj).reshape(9 * C, C2)
    b_fold = params['dw_b'] @ pw.T + params['pw_b']               # (C2,)

    # Lane-dense output: pad the output channel axis to a multiple of 128.
    Np = _round_up(C2, 128)
    w_fold = jnp.pad(w_fold, ((0, 0), (0, Np - C2)))
    b_fold = jnp.pad(b_fold, (0, Np - C2)).reshape(1, Np)

    # bf16 operands (halves HBM read traffic, single-pass MXU); the kernel
    # accumulates in f32 via preferred_element_type, bias is added in f32.
    taps = taps.astype(jnp.bfloat16)
    w_fold = w_fold.astype(jnp.bfloat16)
    b_fold = b_fold.astype(jnp.float32)

    conv = _fused_downsample_gemm(taps, w_fold, b_fold, x.dtype)  # (M, Np)
    conv = conv[:, :C2].reshape(B, Ho * Wo, C2)                   # 'b c h w -> b (h w) c'

    return jnp.concatenate([cls_out[:, None, :], conv], axis=1)


# ------------------------- pure-JAX reference check ------------------------ #

def pool_reference(x, params):
    B, N1, C = x.shape
    H = W = int(round(sqrt(N1 - 1)))
    C2 = 2 * C
    cls_tok = x[:, 0, :]
    tokens = x[:, 1:, :].reshape(B, H, W, C)
    cls_out = cls_tok @ params['cls_w'].T + params['cls_b']
    dw = lax.conv_general_dilated(
        tokens, jnp.transpose(params['dw_w'], (2, 3, 1, 0)),
        window_strides=(2, 2), padding=((1, 1), (1, 1)),
        dimension_numbers=('NHWC', 'HWIO', 'NHWC'),
        feature_group_count=C, precision=lax.Precision.HIGHEST) + params['dw_b']
    pw = lax.conv_general_dilated(
        dw, jnp.transpose(params['pw_w'], (2, 3, 1, 0)),
        window_strides=(1, 1), padding='VALID',
        dimension_numbers=('NHWC', 'HWIO', 'NHWC'),
        precision=lax.Precision.HIGHEST) + params['pw_b']
    pw = pw.reshape(B, -1, C2)
    return jnp.concatenate([cls_out[:, None, :], pw], axis=1)


# ----------------------------------- main ----------------------------------- #

if __name__ == "__main__":
    B, dim, img_size = 2, 4, 8           # tokens: 8x8 grid, +1 cls token
    C, C2 = dim, 2 * dim

    key = jax.random.PRNGKey(0)
    k = jax.random.split(key, 7)
    params = {
        'cls_w': 0.1 * jax.random.normal(k[0], (C2, C), jnp.float32),       # nn.Linear(dim, 2*dim)
        'cls_b': 0.1 * jax.random.normal(k[1], (C2,), jnp.float32),
        'dw_w': 0.1 * jax.random.normal(k[2], (C2, 1, 3, 3), jnp.float32),   # Conv2d(dim,2*dim,3,groups=dim,s=2,p=1)
        'dw_b': 0.1 * jax.random.normal(k[3], (C2,), jnp.float32),
        'pw_w': 0.1 * jax.random.normal(k[4], (C2, C2, 1, 1), jnp.float32),  # Conv2d(2*dim,2*dim,1)
        'pw_b': 0.1 * jax.random.normal(k[5], (C2,), jnp.float32),
    }
    x = jax.random.normal(k[6], (B, 1 + img_size * img_size, C), jnp.float32)

    out = jax.block_until_ready(jax.jit(pool_forward)(x, params))
    ref = pool_reference(x, params)

    assert out.shape == (B, 1 + (img_size // 2) ** 2, C2), out.shape
    # bf16 operands with f32 accumulation vs a HIGHEST-precision f32 reference.
    np.testing.assert_allclose(np.asarray(out), np.asarray(ref), atol=2e-2, rtol=2e-2)
    print("KERNEL_OK")
</pallas_src>

<mosaic_0001>
module attributes {stable_mosaic.version = 11 : i64} {
  func.func @_pool_gemm_single_k_kernel(%arg0: i32, %arg1: memref<32x128xbf16, #tpu.memory_space<vmem>>, %arg2: memref<128x128xbf16, #tpu.memory_space<vmem>>, %arg3: memref<1x128xf32, #tpu.memory_space<vmem>>, %arg4: memref<32x128xf32, #tpu.memory_space<vmem>>) attributes {dimension_semantics = [#tpu.dimension_semantics<parallel>], iteration_bounds = array<i64: 1>, scalar_prefetch = 0 : i64, scratch_operands = 0 : i64, tpu.core_type = #tpu.core_type<tc>, window_params = [{transform_indices = @transform_0, window_bounds = array<i64: 32, 128>}, {pipeline_mode = #tpu.pipeline_mode<synchronous>, transform_indices = @transform_1, window_bounds = array<i64: 128, 128>}, {pipeline_mode = #tpu.pipeline_mode<synchronous>, transform_indices = @transform_2, window_bounds = array<i64: 1, 128>}, {transform_indices = @transform_3, window_bounds = array<i64: 32, 128>}]} {
    %c0 = arith.constant 0 : index
    %c0_0 = arith.constant 0 : index
    %0 = vector.load %arg1[%c0, %c0_0] : memref<32x128xbf16, #tpu.memory_space<vmem>>, vector<32x128xbf16>
    %c0_1 = arith.constant 0 : index
    %c0_2 = arith.constant 0 : index
    %1 = vector.load %arg2[%c0_1, %c0_2] : memref<128x128xbf16, #tpu.memory_space<vmem>>, vector<128x128xbf16>
    %cst = arith.constant dense<0.000000e+00> : vector<32x128xf32>
    %2 = tpu.matmul %0, %1, %cst {dimension_numbers = #tpu.dot_dimension_numbers<[1], [0], [0], [1], [0, 0, 1, 1], [], []>} : vector<32x128xbf16>, vector<128x128xbf16>, vector<32x128xf32> -> vector<32x128xf32>
    %c0_3 = arith.constant 0 : index
    %c0_4 = arith.constant 0 : index
    %3 = vector.load %arg3[%c0_3, %c0_4] : memref<1x128xf32, #tpu.memory_space<vmem>>, vector<1x128xf32>
    %4 = vector.broadcast %3 : vector<1x128xf32> to vector<32x128xf32>
    %5 = arith.addf %2, %4 : vector<32x128xf32>
    %c0_5 = arith.constant 0 : index
    %c0_6 = arith.constant 0 : index
    %6 = vector.load %arg4[%c0_5, %c0_6] : memref<32x128xf32, #tpu.memory_space<vmem>>, vector<32x128xf32>
    tpu.vector_store %arg4[%c0_5, %c0_6], %5 {strides = array<i32>} : memref<32x128xf32, #tpu.memory_space<vmem>>, vector<32x128xf32>,
    return
  }
  func.func @transform_0(%arg0: i32) -> (i32, i32) {
    %c0_i32 = arith.constant 0 : i32
    %c0_i32_0 = arith.constant 0 : i32
    return %arg0, %c0_i32 : i32, i32
  }
  func.func @transform_1(%arg0: i32) -> (i32, i32) {
    %c0_i32 = arith.constant 0 : i32
    %c0_i32_0 = arith.constant 0 : i32
    %c0_i32_1 = arith.constant 0 : i32
    return %c0_i32, %c0_i32_0 : i32, i32
  }
  func.func @transform_2(%arg0: i32) -> (i32, i32) {
    %c0_i32 = arith.constant 0 : i32
    %c0_i32_0 = arith.constant 0 : i32
    %c0_i32_1 = arith.constant 0 : i32
    return %c0_i32, %c0_i32_0 : i32, i32
  }
  func.func @transform_3(%arg0: i32) -> (i32, i32) {
    %c0_i32 = arith.constant 0 : i32
    %c0_i32_0 = arith.constant 0 : i32
    return %arg0, %c0_i32 : i32, i32
  }
}

</mosaic_0001>

<bundles_post_ra>
// kernel: pool_forward.1
= control target key start
LH: loop header
LB: loop body
LE: loop exit
PB: predicated region body
PF: predicated region fallthrough
CT: control target
= control target key end

     0   :  { %s275_s1 = inlined_call_operand.vmem [shape: bf16[128,128], index: 1, kind: input, shape index: {}]   ;;  %s276_s0 = inlined_call_operand.vmem [shape: bf16[32,128], index: 0, kind: input, shape index: {}]   ;;  %s277_s2 = inlined_call_operand.vmem [shape: f32[1,128], index: 2, kind: input, shape index: {}]   ;;  %s278_s3 = inlined_call_operand.vmem [shape: f32[32,128], index: 3, kind: output, shape index: {}]  }
   0x1   :  { %v200_v0 = vld [vmem:[%s275_s1] sm:$0xff]   ;;  %v201_v1 = vld [vmem:[%s275_s1 + $0x8] sm:$0xff]   ;;  %v202_v2 = vld [vmem:[%s275_s1 + $0x10] sm:$0xff]  }
   0x2   :  { %180 = vmatprep.subr.bf16.mxu0 %v200_v0  ;;  %v203_v3 = vld [vmem:[%s275_s1 + $0x18] sm:$0xff]   ;;  %v208_v4 = vld [vmem:[%s276_s0] sm:$0xff]   ;;  %v205_v6 = vld [vmem:[%s275_s1 + $0x28] sm:$0xff]  }
   0x3   :  { %181 = vmatpush3.bf16.msra.mxu0 %v200_v0  ;;  %196 = vmatprep.mubr.bf16.mxu0 %v208_v4  ;;  %v204_v5 = vld [vmem:[%s275_s1 + $0x20] sm:$0xff]   ;;  %v206_v7 = vld [vmem:[%s275_s1 + $0x30] sm:$0xff]   ;;  %v207_v8 = vld [vmem:[%s275_s1 + $0x38] sm:$0xff]  }
   0x4   :  { %182 = vmatprep.subr.bf16.mxu0 %v201_v1  ;;  %v209_v9 = vld [vmem:[%s276_s0 + $0x8] sm:$0xff]   ;;  %v159_v10 = vld [vmem:[%s277_s2] ss:$0 sm:$0xff] }
   0x7   :  { %183 = vmatpush3.bf16.msra.mxu0 %v201_v1 }
   0x8   :  { %184 = vmatprep.subr.bf16.mxu0 %v202_v2 }
   0xb   :  { %185 = vmatpush3.bf16.msra.mxu0 %v202_v2 }
   0xc   :  { %186 = vmatprep.subr.bf16.mxu0 %v203_v3 }
   0xf   :  { %187 = vmatpush3.bf16.msra.mxu0 %v203_v3 }
  0x10   :  { %188 = vmatprep.subr.bf16.mxu0 %v204_v5 }
  0x13   :  { %189 = vmatpush3.bf16.msra.mxu0 %v204_v5 }
  0x14   :  { %190 = vmatprep.subr.bf16.mxu0 %v205_v6 }
  0x17   :  { %191 = vmatpush3.bf16.msra.mxu0 %v205_v6 }
  0x18   :  { %192 = vmatprep.subr.bf16.mxu0 %v206_v7 }
  0x1b   :  { %193 = vmatpush3.bf16.msra.mxu0 %v206_v7 }
  0x1c   :  { %194 = vmatprep.subr.bf16.mxu0 %v207_v8 }
  0x1f   :  { %195 = vmatpush3.bf16.msra.mxu0 %v207_v8 }
  0x22   :  { %197 = vmatmul.mubr.bf16.vlgmr.msra.gmra.mrb[0].mxu0 %v209_v9 }
  0xf5   :  { %v198_v11 = vpop.f32.mrb[0].mxu0 }
  0xf6   :  { %v145_v12 = vadd.f32 %v198_v11, %v159_v10  ;;  %v136_v13 = vpop.f32.mrb[1].mxu0 }
  0xf7   :  { %v137_v14 = vadd.f32 %v159_v10, %v136_v13  ;;  %v199_v15 = vpop.f32.mrb[2].mxu0 }
  0xf8   :  { %153 = vst [vmem:[%s278_s3 + $0x10] sm:$0xff] %v145_v12  ;;  %v148_v16 = vadd.f32 %v199_v15, %v159_v10  ;;  %v139_v17 = vpop.f32.mrb[3].mxu0 }
  0xf9   :  { %151 = vst [vmem:[%s278_s3] sm:$0xff] %v137_v14  ;;  %v140_v18 = vadd.f32 %v159_v10, %v139_v17 }
  0xfa   :  { %154 = vst [vmem:[%s278_s3 + $0x18] sm:$0xff] %v148_v16 }
  0xfb   :  { %152 = vst [vmem:[%s278_s3 + $0x8] sm:$0xff] %v140_v18 }

</bundles_post_ra>
